<compile_context>
chip_gen: v7x
topology: tpu7x:2x2x1
jax: 0.10.0
libtpu: 0.0.40
codegen_flags: <defaults>
</compile_context>

<pallas_src>
import jax
import jax.numpy as jnp
from jax.experimental import pallas as pl
from jax.experimental.pallas import tpu as pltpu


# ----------------------------------------------------------------------------
# Kernel
# ----------------------------------------------------------------------------
def _unembed_kernel(x_ref, wt_ref, b_ref, o_ref, acc_ref):
    """One (tm, tv) logits tile, accumulated over the contraction grid axis.

    x_ref  : (tm, tk) token tile      (compute dtype)
    wt_ref : (tk, tv) W_U^T tile      (compute dtype) -- MXU-native (K, N)
    b_ref  : (1,  tv) bias tile       (f32)
    o_ref  : (tm, tv) logits tile     (out dtype)
    acc_ref: (tm, tv) f32 accumulator (VMEM scratch)
    """
    k = pl.program_id(2)

    @pl.when(k == 0)
    def _init():
        acc_ref[...] = jnp.zeros_like(acc_ref)

    acc_ref[...] += jax.lax.dot_general(
        x_ref[...], wt_ref[...],
        dimension_numbers=(((1,), (0,)), ((), ())),     # (tm,tk) @ (tk,tv)
        preferred_element_type=jnp.float32,             # f32 accumulation on MXU
    )

    @pl.when(k == pl.num_programs(2) - 1)
    def _finalize():
        o_ref[...] = (acc_ref[...] + b_ref[...]).astype(o_ref.dtype)


# ----------------------------------------------------------------------------
# Generation-aware planning helpers
# ----------------------------------------------------------------------------
def _vmem_capacity_bytes():
    """Physical VMEM per TensorCore; conservative fallback if the query fails."""
    try:
        cap = int(pltpu.get_tpu_info().vmem_capacity_bytes)
        if cap > 0:
            return cap
    except Exception:
        pass
    return 64 << 20  # v7x per-core physical VMEM (the smallest of v5e/v6e/v7x)


def _tile_vmem_bytes(tm, tk, tv, xb, wb, ob, w_bufs):
    return (2 * tm * tk * xb            # double-buffered token tile
            + w_bufs * tk * tv * wb     # weight tile buffers
            + 2 * tv * 4                # bias tile (f32)
            + 2 * tm * tv * ob          # output tile
            + tm * tv * 4)              # f32 accumulator scratch


def _plan_tiles(M, D, V, xb, wb, ob, vmem_limit):
    """Choose (tm, tk, tv, w_bufs) that fit the VMEM budget.

    Preference order: largest lane-dense vocab tile (HBM roofline), full-D
    weight strip resident across the whole M sweep (W_U streamed exactly once)
    with a 3-deep weight pipeline, then plain double buffering, then
    K-blocking (contraction grid axis + f32 accumulator).
    """
    budget = (vmem_limit * 85) // 100          # headroom for compiler scratch
    tv_pref = 2048 if vmem_limit >= (80 << 20) else 1024

    tm = M if M <= 256 else 256                # full-dim row tile for decode-sized M

    if V <= tv_pref:
        tv_cands = [V]                         # block dim == full dim: always legal
    else:
        tv_cands = [c for c in (2048, 1024, 512, 256, 128) if c <= tv_pref]

    # K-blocking candidates must divide D exactly (no OOB on the contraction
    # axis) and be 128-lane aligned.
    tk_cands = [c for c in (2048, 1024, 512, 256, 128) if c < D and D % c == 0]

    for tv in tv_cands:
        nv = pl.cdiv(V, tv)
        for w_bufs in ((3, 2) if nv >= 2 else (2,)):
            if _tile_vmem_bytes(tm, D, tv, xb, wb, ob, w_bufs) <= budget:
                return tm, D, tv, w_bufs
        for tk in tk_cands:                    # K-blocked W DMA pipelines fine at 2 buffers
            if _tile_vmem_bytes(tm, tk, tv, xb, wb, ob, 2) <= budget:
                return tm, tk, tv, 2

    # Last resort: smallest plan (may exceed the soft budget slightly).
    tv = tv_cands[-1]
    tk = tk_cands[-1] if tk_cands else D
    return tm, tk, tv, 2


def _weight_block_spec(tk, tv, w_bufs):
    index_map = lambda v, m, k: (k, v)
    if w_bufs > 2:
        # Deep pipeline: the next vocab tile's weight strip is prefetched over
        # 2+ inner m-steps, hiding the outer-v boundary DMA.
        try:
            return pl.BlockSpec((tk, tv), index_map,
                                pipeline_mode=pl.Buffered(w_bufs))
        except (TypeError, AttributeError):    # older jax without pipeline_mode
            pass
    return pl.BlockSpec((tk, tv), index_map)


# ----------------------------------------------------------------------------
# Hot-path entry point (expects pre-transposed / pre-cast weights)
# ----------------------------------------------------------------------------
def unembed_prepared(tokens, w_t, b_row, *, out_dtype=None, tiles=None):
    """logits = tokens @ w_t + b_row  (== einsum('vm,bpm->bpv', W_U, tokens) + b_U).

    tokens: (B, P, D); w_t: (D, V) pre-transposed/cast W_U; b_row: (1, V) f32.
    """
    B, P, D = tokens.shape
    D2, V = w_t.shape
    assert D == D2 and b_row.shape == (1, V)
    M = B * P
    compute_dtype = w_t.dtype
    out_dtype = tokens.dtype if out_dtype is None else out_dtype

    x2d = tokens.reshape(M, D)
    if x2d.dtype != compute_dtype:
        x2d = x2d.astype(compute_dtype)

    xb = jnp.dtype(compute_dtype).itemsize
    wb = jnp.dtype(w_t.dtype).itemsize
    ob = jnp.dtype(out_dtype).itemsize

    vmem_cap = _vmem_capacity_bytes()
    # ~48 MiB on 64 MiB v7x cores, ~96 MiB on 128 MiB v5e/v6e cores.
    vmem_limit = max(32 << 20, (vmem_cap * 3) // 4)

    if tiles is None:
        tm, tk, tv, w_bufs = _plan_tiles(M, D, V, xb, wb, ob, vmem_limit)
    else:
        tm, tk, tv, w_bufs = tiles
    if tk < D:
        assert D % tk == 0, "contraction tile must divide d_model (no OOB on K)"
        assert tk % 128 == 0, "contraction tile must be 128-lane aligned"

    nv, nm, nk = pl.cdiv(V, tv), pl.cdiv(M, tm), pl.cdiv(D, tk)

    # Token tiles re-streamed once per vocab tile; weight stream is exactly-once
    # when the full-D strip is resident (nk == 1), else once per M tile.
    cost = pl.CostEstimate(
        flops=2 * M * V * D,
        transcendentals=0,
        bytes_accessed=int(nv * M * D * xb
                           + (nm if nk > 1 else 1) * V * D * wb
                           + M * V * ob
                           + V * 4),
    )

    out2d = pl.pallas_call(
        _unembed_kernel,
        out_shape=jax.ShapeDtypeStruct((M, V), out_dtype),
        grid_spec=pltpu.PrefetchScalarGridSpec(
            num_scalar_prefetch=0,
            # vocab OUTER, rows middle, contraction INNER (reduction axis last).
            grid=(nv, nm, nk),
            in_specs=[
                pl.BlockSpec((tm, tk), lambda v, m, k: (m, k)),   # tokens
                _weight_block_spec(tk, tv, w_bufs),               # W_U^T
                pl.BlockSpec((1, tv), lambda v, m, k: (0, v)),    # bias
            ],
            out_specs=pl.BlockSpec((tm, tv), lambda v, m, k: (m, v)),
            scratch_shapes=[pltpu.VMEM((tm, tv), jnp.float32)],
        ),
        compiler_params=pltpu.CompilerParams(
            # Shard only the vocab axis across TensorCores: W_U is read exactly
            # once per chip and each core writes a disjoint lane-dense slab.
            dimension_semantics=("parallel", "arbitrary", "arbitrary"),
            vmem_limit_bytes=int(vmem_limit),
        ),
        cost_estimate=cost,
    )(x2d, w_t, b_row)

    return out2d.reshape(B, P, V)


def unembed(tokens, W_U, b_U, *, compute_dtype=jnp.bfloat16, out_dtype=None,
            tiles=None):
    """Convenience one-shot wrapper (casts/transposes W_U on every call).

    Prefer the `Unembed` class, which hoists that preprocessing to init.
    """
    cd = W_U.dtype if compute_dtype is None else compute_dtype
    w_t = W_U.astype(cd).T
    b_row = b_U.astype(jnp.float32).reshape(1, -1)
    return unembed_prepared(tokens, w_t, b_row, out_dtype=out_dtype, tiles=tiles)


class Unembed:
    """Pallas-TPU port of the PyTorch `Unembed` module.

    forward(tokens) = einsum('vm,bpm->bpv', W_U, tokens) + b_U

    `compute_dtype` is an explicit caller choice: bfloat16 (default) halves the
    weight HBM stream and doubles MXU rate (f32 accumulation either way); pass
    jnp.float32 (or None = keep W_U.dtype) when exact f32 logits are required.
    The W_U cast + transpose happens ONCE here, not on every forward call.
    """

    def __init__(self, cfg, W_U, b_U, *, compute_dtype=jnp.bfloat16,
                 out_dtype=None):
        self.cfg = cfg
        V, D = W_U.shape
        assert V == cfg["d_vocab"] and D == cfg["d_model"] and b_U.shape == (V,)
        cd = W_U.dtype if compute_dtype is None else compute_dtype
        self.w_t = jnp.asarray(W_U).astype(cd).T                  # (d_model, d_vocab)
        self.b_row = jnp.asarray(b_U).astype(jnp.float32).reshape(1, V)
        self.out_dtype = out_dtype

    def __call__(self, tokens):
        return unembed_prepared(tokens, self.w_t, self.b_row,
                                out_dtype=self.out_dtype)

    forward = __call__


if __name__ == "__main__":
    # Small config consistent with the module's forward:
    #   d_model = 32, d_vocab = 128, batch = 2, pos (seq) = 8
    cfg = {"d_model": 32, "d_vocab": 128}
    B, P = 2, 8

    key = jax.random.PRNGKey(0)
    k_tok, k_w, k_b, k_tok3, k_w3, k_b3 = jax.random.split(key, 6)

    tokens = jax.random.normal(k_tok, (B, P, cfg["d_model"]), dtype=jnp.float32)
    W_U = jax.random.normal(k_w, (cfg["d_vocab"], cfg["d_model"]),
                            dtype=jnp.float32) * 0.02
    b_U = jax.random.normal(k_b, (cfg["d_vocab"],), dtype=jnp.float32) * 0.02

    ref = jnp.einsum("vm,bpm->bpv", W_U, tokens) + b_U

    # 1) Exact-dtype path (explicit f32 compute, matches the PyTorch module).
    mod_f32 = Unembed(cfg, W_U, b_U, compute_dtype=jnp.float32)
    out_f32 = jax.block_until_ready(mod_f32(tokens))
    assert out_f32.shape == (B, P, cfg["d_vocab"])
    assert jnp.allclose(out_f32, ref, atol=2e-3, rtol=2e-3)

    # 2) Default fast path (bf16 operands on the MXU, f32 accumulation + bias).
    mod_bf16 = Unembed(cfg, W_U, b_U)                 # compute_dtype = bf16
    out_bf16 = jax.block_until_ready(mod_bf16(tokens))
    tok_q = tokens.astype(jnp.bfloat16).astype(jnp.float32)
    w_q = W_U.astype(jnp.bfloat16).astype(jnp.float32)
    ref_q = jnp.einsum("vm,bpm->bpv", w_q, tok_q) + b_U
    assert jnp.allclose(out_bf16, ref_q, atol=1e-4, rtol=1e-4)
    assert jnp.allclose(out_bf16, ref, atol=2e-2, rtol=2e-2)

    # 3) Ragged edges (cdiv grid, no padding), K-blocked accumulation and the
    #    3-deep weight pipeline, exercised at small shapes via explicit tiles.
    D3, V3, B3, P3 = 256, 1100, 3, 100                # M=300: ragged m and v edges
    tok3 = jax.random.normal(k_tok3, (B3, P3, D3), dtype=jnp.float32)
    W3 = jax.random.normal(k_w3, (V3, D3), dtype=jnp.float32) * 0.02
    b3 = jax.random.normal(k_b3, (V3,), dtype=jnp.float32) * 0.02
    out3 = unembed(tok3, W3, b3, compute_dtype=jnp.float32,
                   tiles=(256, 128, 512, 3))          # (tm, tk, tv, w_bufs)
    out3 = jax.block_until_ready(out3)
    ref3 = jnp.einsum("vm,bpm->bpv", W3, tok3) + b3
    assert out3.shape == (B3, P3, V3)
    assert jnp.allclose(out3, ref3, atol=5e-3, rtol=5e-3)

    print("KERNEL_OK")
</pallas_src>

<mosaic_0001>
module attributes {stable_mosaic.version = 11 : i64} {
  func.func @_unembed_kernel(%arg0: i32, %arg1: i32, %arg2: i32, %arg3: memref<16x32xf32, #tpu.memory_space<vmem>>, %arg4: memref<32x128xf32, #tpu.memory_space<vmem>>, %arg5: memref<1x128xf32, #tpu.memory_space<vmem>>, %arg6: memref<16x128xf32, #tpu.memory_space<vmem>>, %arg7: memref<16x128xf32, #tpu.memory_space<vmem>>) attributes {dimension_semantics = [#tpu.dimension_semantics<parallel>, #tpu.dimension_semantics<arbitrary>, #tpu.dimension_semantics<arbitrary>], iteration_bounds = array<i64: 1, 1, 1>, scalar_prefetch = 0 : i64, scratch_operands = 1 : i64, tpu.core_type = #tpu.core_type<tc>, window_params = [{transform_indices = @transform_0, window_bounds = array<i64: 16, 32>}, {transform_indices = @transform_1, window_bounds = array<i64: 32, 128>}, {transform_indices = @transform_2, window_bounds = array<i64: 1, 128>}, {transform_indices = @transform_3, window_bounds = array<i64: 16, 128>}]} {
    %c0_i32 = arith.constant 0 : i32
    %0 = arith.cmpi eq, %arg2, %c0_i32 : i32
    %1 = arith.extui %0 : i1 to i32
    %c0_i32_0 = arith.constant 0 : i32
    %2 = arith.cmpi ne, %1, %c0_i32_0 : i32
    scf.if %2 {
      %cst_10 = arith.constant 0.000000e+00 : f32
      %12 = vector.broadcast %cst_10 : f32 to vector<16x128xf32>
      %c0_11 = arith.constant 0 : index
      %c0_12 = arith.constant 0 : index
      %13 = vector.load %arg7[%c0_11, %c0_12] : memref<16x128xf32, #tpu.memory_space<vmem>>, vector<16x128xf32>
      tpu.vector_store %arg7[%c0_11, %c0_12], %12 {strides = array<i32>} : memref<16x128xf32, #tpu.memory_space<vmem>>, vector<16x128xf32>,
    } else {
    }
    %c0 = arith.constant 0 : index
    %c0_1 = arith.constant 0 : index
    %3 = vector.load %arg7[%c0, %c0_1] : memref<16x128xf32, #tpu.memory_space<vmem>>, vector<16x128xf32>
    %c0_2 = arith.constant 0 : index
    %c0_3 = arith.constant 0 : index
    %4 = vector.load %arg3[%c0_2, %c0_3] : memref<16x32xf32, #tpu.memory_space<vmem>>, vector<16x32xf32>
    %c0_4 = arith.constant 0 : index
    %c0_5 = arith.constant 0 : index
    %5 = vector.load %arg4[%c0_4, %c0_5] : memref<32x128xf32, #tpu.memory_space<vmem>>, vector<32x128xf32>
    %cst = arith.constant dense<0.000000e+00> : vector<16x128xf32>
    %6 = tpu.matmul %4, %5, %cst {dimension_numbers = #tpu.dot_dimension_numbers<[1], [0], [0], [1], [0, 0, 1, 1], [], []>} : vector<16x32xf32>, vector<32x128xf32>, vector<16x128xf32> -> vector<16x128xf32>
    %7 = arith.addf %3, %6 : vector<16x128xf32>
    %c0_6 = arith.constant 0 : index
    %c0_7 = arith.constant 0 : index
    %8 = vector.load %arg7[%c0_6, %c0_7] : memref<16x128xf32, #tpu.memory_space<vmem>>, vector<16x128xf32>
    tpu.vector_store %arg7[%c0_6, %c0_7], %7 {strides = array<i32>} : memref<16x128xf32, #tpu.memory_space<vmem>>, vector<16x128xf32>,
    %c0_i32_8 = arith.constant 0 : i32
    %9 = arith.cmpi eq, %arg2, %c0_i32_8 : i32
    %10 = arith.extui %9 : i1 to i32
    %c0_i32_9 = arith.constant 0 : i32
    %11 = arith.cmpi ne, %10, %c0_i32_9 : i32
    scf.if %11 {
      %c0_10 = arith.constant 0 : index
      %c0_11 = arith.constant 0 : index
      %12 = vector.load %arg7[%c0_10, %c0_11] : memref<16x128xf32, #tpu.memory_space<vmem>>, vector<16x128xf32>
      %c0_12 = arith.constant 0 : index
      %c0_13 = arith.constant 0 : index
      %13 = vector.load %arg5[%c0_12, %c0_13] : memref<1x128xf32, #tpu.memory_space<vmem>>, vector<1x128xf32>
      %14 = vector.broadcast %13 : vector<1x128xf32> to vector<16x128xf32>
      %15 = arith.addf %12, %14 : vector<16x128xf32>
      %c0_14 = arith.constant 0 : index
      %c0_15 = arith.constant 0 : index
      %16 = vector.load %arg6[%c0_14, %c0_15] : memref<16x128xf32, #tpu.memory_space<vmem>>, vector<16x128xf32>
      tpu.vector_store %arg6[%c0_14, %c0_15], %15 {strides = array<i32>} : memref<16x128xf32, #tpu.memory_space<vmem>>, vector<16x128xf32>,
    } else {
    }
    return
  }
  func.func @transform_0(%arg0: i32, %arg1: i32, %arg2: i32) -> (i32, i32) {
    %c0_i32 = arith.constant 0 : i32
    return %arg1, %arg2 : i32, i32
  }
  func.func @transform_1(%arg0: i32, %arg1: i32, %arg2: i32) -> (i32, i32) {
    %c0_i32 = arith.constant 0 : i32
    return %arg2, %arg0 : i32, i32
  }
  func.func @transform_2(%arg0: i32, %arg1: i32, %arg2: i32) -> (i32, i32) {
    %c0_i32 = arith.constant 0 : i32
    %c0_i32_0 = arith.constant 0 : i32
    return %c0_i32, %arg0 : i32, i32
  }
  func.func @transform_3(%arg0: i32, %arg1: i32, %arg2: i32) -> (i32, i32) {
    %c0_i32 = arith.constant 0 : i32
    return %arg1, %arg0 : i32, i32
  }
}

</mosaic_0001>

<bundles_post_ra>
// kernel: tpu_custom_call.1
= control target key start
LH: loop header
LB: loop body
LE: loop exit
PB: predicated region body
PF: predicated region fallthrough
CT: control target
= control target key end

     0   :  { %8 = vsyncpa [#allocation4], 0  ;;  %s355_s0 = inlined_call_operand.hbm [shape: f32[16,32], index: 0, kind: input, shape index: {}]   ;;  %s356_s1 = inlined_call_operand.hbm [shape: f32[32,128], index: 1, kind: input, shape index: {}]   ;;  %s357_s2 = inlined_call_operand.vmem [shape: f32[1,128], index: 2, kind: input, shape index: {}]   ;;  %s358_s3 = inlined_call_operand.hbm [shape: f32[16,128], index: 3, kind: output, shape index: {}]  }
   0x1   :  { %9 = vsyncpa [#allocation7], 0 }
   0x2   :  { %10 = vsyncpa [#allocation5], 0  ;;  %s282_s12 = smov [#allocation3]   ;;  %s210_s16 = scalar_lea.hbm %s355_s0, 256 }
   0x3   :  { %s16_s13 = sshll.u32 %s282_s12, 4  ;;  %p211_p0 = scmp.ne.s32.totalorder %s355_s0, %s210_s16  ;;  %s17_s13 = int_to_ptr.vmem [resolvable:$true] %s16_s13 }
   0x4   :  { %p214_p1 = scmp.lt.u32.totalorder %s210_s16, %s355_s0 }
   0x6   :  { %p216_p2 = pnand %p214_p1, %p211_p0 }
   0x8   :  { %219 = shalt.err (!%p216_p2)
}
   0x9   :  { %s220_s21 = scalar_lea.vmem %s17_s13, 256  ;;  %p225_p4 = scmp.lt.s32.totalorder %s17_s13, %s17_s13 }
   0xa   :  { %p221_p3 = scmp.ne.s32.totalorder %s17_s13, %s220_s21  ;;  %p226_p5 = scmp.lt.s32.totalorder %s220_s21, %s220_s21 }
   0xc   :  { %p227_p6 = por %p226_p5, %p225_p4 }
   0xe   :  { %p228_p7 = pnand %p227_p6, %p221_p3 }
  0x10   :  { %231 = shalt.err (!%p228_p7)
}
  0x11   :  { %s283_s22 = smov 128   ;;  %s284_s23 = smov 8  }
  0x12   :  { %22 = dma.hbm_to_vmem [thread:$0]  %s355_s0, 256, %s17_s13, [#allocation4], %s283_s22, %s283_s22, %s284_s23  }
  0x13   :  { %s285_s26 = smov [#allocation6]   ;;  %s232_s30 = scalar_lea.hbm %s356_s1, 512 }
  0x14   :  { %s28_s27 = sshll.u32 %s285_s26, 4  ;;  %p233_p8 = scmp.ne.s32.totalorder %s356_s1, %s232_s30  ;;  %s29_s27 = int_to_ptr.vmem [resolvable:$true] %s28_s27 }
  0x15   :  { %p236_p9 = scmp.lt.u32.totalorder %s232_s30, %s356_s1 }
  0x17   :  { %p238_p10 = pnand %p236_p9, %p233_p8 }
  0x19   :  { %241 = shalt.err (!%p238_p10)
}
  0x1a   :  { %s242_s8 = scalar_lea.vmem %s29_s27, 512  ;;  %p247_p12 = scmp.lt.s32.totalorder %s29_s27, %s29_s27 }
  0x1b   :  { %p243_p11 = scmp.ne.s32.totalorder %s29_s27, %s242_s8  ;;  %p248_p13 = scmp.lt.s32.totalorder %s242_s8, %s242_s8 }
  0x1d   :  { %p249_p0 = por %p248_p13, %p247_p12 }
  0x1f   :  { %p250_p1 = pnand %p249_p0, %p243_p11 }
  0x21   :  { %253 = shalt.err (!%p250_p1)
}
  0x22   :  { %34 = dma.hbm_to_vmem [thread:$0]  %s356_s1, 512, %s29_s27, [#allocation7], %s283_s22, %s283_s22, %s284_s23  }
  0x23   :  { %276 = dma.done.wait [#allocation4], 256  }
  0x24   :  { %277 = vsyncadd [#allocation4], 4294967040 }
  0x25   :  { %278 = dma.done.wait [#allocation7], 512  }
  0x26   :  { %279 = vsyncadd [#allocation7], 4294966784  ;;  %vm57_vm0 = vcmask 261120   ;;  %v53_v0 = vld [vmem:[#allocation6] sm:$0xff]  ;;  %v54_v1 = vld [vmem:[#allocation6 + $0x8] sm:$0xff]  ;;  %s286_s11 = smov [#allocation8]  }
  0x27   :  { %v55_v2 = vld [vmem:[#allocation6 + $0x10] sm:$0xff]  ;;  %v197_v3 = vpack.c.bf16 %v54_v1, %v53_v0  ;;  %v56_v4 = vld [vmem:[#allocation6 + $0x18] sm:$0xff]  ;;  %s164_s12 = sshll.u32 %s286_s11, 4  ;;  %s165_s12 = int_to_ptr.vmem [resolvable:$true] %s164_s12 }
  0x28   :  { %v51_v5 = vld [vmem:[#allocation3] sm:$0xff]  ;;  %v201_v6 = vpack.c.bf16 %v56_v4, %v55_v2  ;;  %v52_v7 = vld [vmem:[#allocation3 + $0x8] sm:$0xff]  ;;  %s254_s13 = scalar_lea.vmem %s165_s12, 256  ;;  %p259_p3 = scmp.lt.s32.totalorder %s165_s12, %s165_s12 }
  0x29   :  { %194 = vmatprep.mubr.msk.f32.mxu0 %vm57_vm0, %v51_v5  ;;  %198 = vmatprep.subr.bf16.mxu0 %v197_v3  ;;  %v179_v8 = vld [vmem:[%s357_s2] ss:$0 sm:$0xff]  ;;  %p255_p2 = scmp.ne.s32.totalorder %s165_s12, %s254_s13  ;;  %p260_p4 = scmp.lt.s32.totalorder %s254_s13, %s254_s13 }
  0x2a   :  { %200 = vmatpush3.bf16.msra.mxu0 %v197_v3 }
  0x2b   :  { %202 = vmatprep.subr.bf16.mxu0 %v201_v6  ;;  %p261_p5 = por %p260_p4, %p259_p3 }
  0x2d   :  { %p262_p6 = pnand %p261_p5, %p255_p2 }
  0x2e   :  { %204 = vmatpush3.bf16.msra.mxu0 %v201_v6 }
  0x31   :  { %195 = vmatmul.mubr.msk.f32.vlgmr.msra.gmra.mrb[0].mxu0 %vm57_vm0, %v52_v7 }
 0x104   :  { %v196_v9 = vpop.f32.mrb[0].mxu0 }
 0x105   :  { %v156_v10 = vadd.f32 %v196_v9, %v179_v8  ;;  %v130_v11 = vpop.f32.mrb[1].mxu0 }
 0x106   :  { %v155_v12 = vadd.f32 %v179_v8, %v130_v11 }
 0x107   :  { %158 = vst [vmem:[#allocation8 + $0x8] sm:$0xff] %v156_v10 }
 0x108   :  { %157 = vst [vmem:[#allocation8] sm:$0xff] %v155_v12 }
 0x109   :  { %265 = shalt.err (!%p262_p6)
}
 0x10a   :  { %s266_s2 = scalar_lea.hbm %s358_s3, 256 }
 0x10b   :  { %p267_p7 = scmp.ne.s32.totalorder %s358_s3, %s266_s2  ;;  %p270_p8 = scmp.lt.u32.totalorder %s266_s2, %s358_s3 }
 0x10d   :  { %p272_p9 = pnand %p270_p8, %p267_p7 }
 0x10f   :  { %275 = shalt.err (!%p272_p9)
}
 0x110   :  { %170 = dma.vmem_to_hbm [thread:$0]  %s165_s12, 256, %s358_s3, [#allocation5], %s283_s22, %s283_s22, %s284_s23  }
 0x111   :  { %280 = dma.done.wait [#allocation5], 256  }
 0x112   :  { %281 = vsyncadd [#allocation5], 4294967040 }
 0x113   :  { %174 = vsyncpa [#allocation4], 1 }
 0x114   :  { %175 = vsyncpa [#allocation7], 1 }
 0x115   :  { %176 = vsyncpa [#allocation5], 1 }

</bundles_post_ra>
